<compile_context>
chip_gen: v6e
topology: v6e:2x2x1
jax: 0.10.0
libtpu: 0.0.40
codegen_flags: <defaults>
</compile_context>

<pallas_src>
import functools

import jax
import jax.numpy as jnp
from jax.experimental import pallas as pl
from jax.experimental.pallas import tpu as pltpu


def _round_up(x, m):
    return ((x + m - 1) // m) * m


def _vmem_capacity_bytes():
    try:
        return int(pltpu.get_tpu_info().vmem_capacity_bytes)
    except Exception:
        return 64 << 20  # conservative default (v7x per-core VMEM)


def explainer_kernel(u_ref, i_ref,
                     wu_ref, bu_ref,
                     wi_ref, bi_ref,
                     w1u_ref, w1i_ref, b1_ref,
                     w2_ref, b2_ref,
                     o_ref, *, compute_dtype):
    cd = compute_dtype
    # In-kernel cast: raw (typically f32) inputs are streamed from HBM exactly
    # once; the VPU cast hides under the MXU.
    u = u_ref[...].astype(cd)
    it = i_ref[...].astype(cd)

    # users_fc / items_fc: f32 accumulation, f32 biases.
    user_out = jnp.dot(u, wu_ref[...], preferred_element_type=jnp.float32) + bu_ref[...]
    item_out = jnp.dot(it, wi_ref[...], preferred_element_type=jnp.float32) + bi_ref[...]

    # bottleneck: Tanh -> Linear(2H->H) -> Tanh -> Linear(H->user) -> Sigmoid.
    # cat((tanh(u), tanh(i)), -1) @ W1 == tanh(u) @ W1[:H] + tanh(i) @ W1[H:]
    # (split form avoids a lane-axis concatenate inside the kernel).
    hu = jnp.tanh(user_out.astype(cd))
    hi = jnp.tanh(item_out.astype(cd))
    h = (jnp.dot(hu, w1u_ref[...], preferred_element_type=jnp.float32)
         + jnp.dot(hi, w1i_ref[...], preferred_element_type=jnp.float32)
         + b1_ref[...])
    h = jnp.tanh(h.astype(cd))
    logits = jnp.dot(h, w2_ref[...], preferred_element_type=jnp.float32) + b2_ref[...]
    o_ref[...] = jax.nn.sigmoid(logits.astype(cd)).astype(o_ref.dtype)


@functools.partial(jax.jit, static_argnames=("batch_tile", "compute_dtype"))
def explainer_forward(user_tensor, item_tensor, params, *,
                      batch_tile=1024, compute_dtype=jnp.bfloat16):
    """Explainer forward pass as one Pallas TPU kernel, tiled over batch."""
    B, user_size = user_tensor.shape
    _, item_size = item_tensor.shape
    hidden = params["wu"].shape[1]

    f32 = jnp.float32
    cd = jnp.dtype(compute_dtype)
    out_dtype = f32 if cd == jnp.dtype(f32) else compute_dtype
    cd_sz = cd.itemsize
    out_sz = jnp.dtype(out_dtype).itemsize
    in_sz_u = user_tensor.dtype.itemsize
    in_sz_i = item_tensor.dtype.itemsize

    # ---- lane-dense output: pad final N (user_size) to a multiple of 128 ----
    n_pad = _round_up(user_size, 128)

    # ---- batch tile derived from VMEM capacity (v7x: 64 MiB, v5e/v6e: 128) ----
    vmem_cap = _vmem_capacity_bytes()
    budget = int(0.45 * vmem_cap)
    weight_bytes = (cd_sz * (user_size * hidden + item_size * hidden
                             + 2 * hidden * hidden + hidden * n_pad)
                    + 4 * (3 * hidden + n_pad))
    per_row = (2 * (in_sz_u * user_size + in_sz_i * item_size)   # 2x-buffered input tiles
               + 2 * out_sz * n_pad                              # 2x-buffered output tile
               + 4 * (3 * hidden + 2 * n_pad)                    # f32 intermediates
               + cd_sz * (user_size + item_size + 3 * hidden + n_pad))  # bf16 casts
    tb_vmem = max(128, ((budget - weight_bytes) // max(per_row, 1)) // 128 * 128)
    tb = max(128, min(_round_up(batch_tile, 128), _round_up(B, 128), tb_vmem))
    # v7x has 2 TensorCores/chip: give the "parallel" batch axis >= 2 steps when
    # the batch allows, so both cores get work (a tiny extra step on v5e/v6e).
    if B > 128 and pl.cdiv(B, tb) < 2:
        tb = max(128, _round_up(pl.cdiv(B, 2), 128))
    steps = pl.cdiv(B, tb)

    vmem_needed = weight_bytes + tb * per_row
    vmem_limit = int(min(max(vmem_needed * 1.4, 32 << 20), int(0.9 * vmem_cap)))

    # ---- parameters (transposed wrt PyTorch: (in_features, out_features)) ----
    wu = params["wu"].astype(compute_dtype)
    wi = params["wi"].astype(compute_dtype)
    bu = params["bu"].reshape(1, hidden).astype(f32)
    bi = params["bi"].reshape(1, hidden).astype(f32)
    w1 = params["w1"].astype(compute_dtype)              # (2H, H)
    w1u, w1i = w1[:hidden, :], w1[hidden:, :]
    b1 = params["b1"].reshape(1, hidden).astype(f32)
    w2 = params["w2"].astype(compute_dtype)              # (H, user_size)
    b2 = params["b2"].reshape(1, user_size).astype(f32)
    if n_pad != user_size:
        w2 = jnp.pad(w2, ((0, 0), (0, n_pad - user_size)))
        b2 = jnp.pad(b2, ((0, 0), (0, n_pad - user_size)))

    def batch_spec(feat):
        return pl.BlockSpec((tb, feat), lambda b: (b, 0))

    def param_spec(arr):
        # Constant index map -> block is DMA'd once; single-buffer it so the
        # resident weights don't take 2x VMEM.
        return pl.BlockSpec(arr.shape, lambda b: (0,) * arr.ndim,
                            pipeline_mode=pl.Buffered(1))

    rows = steps * tb
    flops = 2 * rows * hidden * (user_size + item_size + 2 * hidden + n_pad)
    transcendentals = rows * (3 * hidden + n_pad)
    bytes_accessed = (user_tensor.size * in_sz_u + item_tensor.size * in_sz_i
                      + (wu.size + wi.size + w1.size + w2.size) * cd_sz
                      + (bu.size + bi.size + b1.size + b2.size) * 4
                      + B * n_pad * out_sz)

    out = pl.pallas_call(
        functools.partial(explainer_kernel, compute_dtype=compute_dtype),
        out_shape=jax.ShapeDtypeStruct((B, n_pad), out_dtype),
        grid_spec=pltpu.PrefetchScalarGridSpec(
            num_scalar_prefetch=0,
            grid=(steps,),
            in_specs=[
                batch_spec(user_size),       # user_tensor tile (raw dtype)
                batch_spec(item_size),       # item_tensor tile (raw dtype)
                param_spec(wu), param_spec(bu),     # users_fc
                param_spec(wi), param_spec(bi),     # items_fc
                param_spec(w1u), param_spec(w1i), param_spec(b1),   # bottleneck L1
                param_spec(w2), param_spec(b2),                      # bottleneck L2
            ],
            out_specs=batch_spec(n_pad),
        ),
        compiler_params=pltpu.CompilerParams(
            dimension_semantics=("parallel",),
            vmem_limit_bytes=vmem_limit),
        cost_estimate=pl.CostEstimate(
            flops=int(flops),
            transcendentals=int(transcendentals),
            bytes_accessed=int(bytes_accessed)),
    )(user_tensor, item_tensor, wu, bu, wi, bi, w1u, w1i, b1, w2, b2)

    # drop lane padding only (no batch padding / row slice was introduced).
    return out if n_pad == user_size else out[:, :user_size]


def init_params(key, user_size, item_size, hidden_size):
    """Deterministic PyTorch-Linear-style init (uniform(-1/sqrt(fan_in), +))."""
    ks = jax.random.split(key, 8)

    def lin(kw, kb, fan_in, fan_out):
        bound = 1.0 / jnp.sqrt(fan_in)
        w = jax.random.uniform(kw, (fan_in, fan_out), jnp.float32, -bound, bound)
        b = jax.random.uniform(kb, (fan_out,), jnp.float32, -bound, bound)
        return w, b

    wu, bu = lin(ks[0], ks[1], user_size, hidden_size)
    wi, bi = lin(ks[2], ks[3], item_size, hidden_size)
    w1, b1 = lin(ks[4], ks[5], 2 * hidden_size, hidden_size)
    w2, b2 = lin(ks[6], ks[7], hidden_size, user_size)
    return dict(wu=wu, bu=bu, wi=wi, bi=bi, w1=w1, b1=b1, w2=w2, b2=b2)


def explainer_ref(user_tensor, item_tensor, params):
    """Pure-JAX f32 (highest matmul precision) reference of the PyTorch forward."""
    hp = jax.lax.Precision.HIGHEST
    u = user_tensor.astype(jnp.float32)
    it = item_tensor.astype(jnp.float32)
    uo = jnp.dot(u, params["wu"], precision=hp) + params["bu"]
    io = jnp.dot(it, params["wi"], precision=hp) + params["bi"]
    comb = jnp.concatenate([uo, io], axis=-1)
    h = jnp.dot(jnp.tanh(comb), params["w1"], precision=hp) + params["b1"]
    h = jnp.dot(jnp.tanh(h), params["w2"], precision=hp) + params["b2"]
    return jax.nn.sigmoid(h)


if __name__ == "__main__":
    B, USER, ITEM, HID = 8, 32, 16, 32

    key = jax.random.PRNGKey(0)
    k_u, k_i, k_p, k_u2, k_i2 = jax.random.split(key, 5)
    user_tensor = jax.random.normal(k_u, (B, USER), jnp.float32)
    item_tensor = jax.random.normal(k_i, (B, ITEM), jnp.float32)
    params = init_params(k_p, USER, ITEM, HID)
    ref = explainer_ref(user_tensor, item_tensor, params)

    # 1) f32-operand path -> checks the kernel algebra (tolerance covers MXU
    #    f32-matmul pass-count differences vs. the XLA reference).
    out_f32 = jax.block_until_ready(
        explainer_forward(user_tensor, item_tensor, params, compute_dtype=jnp.float32))
    assert out_f32.shape == (B, USER) and out_f32.dtype == jnp.float32
    assert jnp.allclose(out_f32, ref, atol=2e-3, rtol=2e-3), "f32 mismatch vs reference"

    # 2) default perf path: bf16 matmul operands + bf16 EUP + bf16 output,
    #    f32 accumulation/biases.
    out_bf16 = jax.block_until_ready(explainer_forward(user_tensor, item_tensor, params))
    assert out_bf16.shape == (B, USER) and out_bf16.dtype == jnp.bfloat16
    assert jnp.allclose(out_bf16.astype(jnp.float32), ref, atol=3e-2, rtol=3e-2), \
        "bf16 mismatch vs reference"

    # 3) non-tile-multiple batch exercises the ragged (clipped) tail block and
    #    the >=2-step grid heuristic.
    B2 = 300
    user2 = jax.random.normal(k_u2, (B2, USER), jnp.float32)
    item2 = jax.random.normal(k_i2, (B2, ITEM), jnp.float32)
    out2 = jax.block_until_ready(explainer_forward(user2, item2, params))
    ref2 = explainer_ref(user2, item2, params)
    assert out2.shape == (B2, USER)
    assert jnp.allclose(out2.astype(jnp.float32), ref2, atol=3e-2, rtol=3e-2), \
        "ragged-batch mismatch"

    print("KERNEL_OK")
</pallas_src>

<mosaic_0001>
module attributes {stable_mosaic.version = 11 : i64} {
  func.func @explainer_kernel(%arg0: i32, %arg1: memref<128x32xf32, #tpu.memory_space<vmem>>, %arg2: memref<128x16xf32, #tpu.memory_space<vmem>>, %arg3: memref<32x32xf32, #tpu.memory_space<vmem>>, %arg4: memref<1x32xf32, #tpu.memory_space<vmem>>, %arg5: memref<16x32xf32, #tpu.memory_space<vmem>>, %arg6: memref<1x32xf32, #tpu.memory_space<vmem>>, %arg7: memref<32x32xf32, #tpu.memory_space<vmem>>, %arg8: memref<32x32xf32, #tpu.memory_space<vmem>>, %arg9: memref<1x32xf32, #tpu.memory_space<vmem>>, %arg10: memref<32x128xf32, #tpu.memory_space<vmem>>, %arg11: memref<1x128xf32, #tpu.memory_space<vmem>>, %arg12: memref<128x128xf32, #tpu.memory_space<vmem>>) attributes {dimension_semantics = [#tpu.dimension_semantics<parallel>], iteration_bounds = array<i64: 1>, scalar_prefetch = 0 : i64, scratch_operands = 0 : i64, tpu.core_type = #tpu.core_type<tc>, window_params = [{transform_indices = @transform_0, window_bounds = array<i64: 128, 32>}, {transform_indices = @transform_1, window_bounds = array<i64: 128, 16>}, {pipeline_mode = #tpu.pipeline_mode<synchronous>, transform_indices = @transform_2, window_bounds = array<i64: 32, 32>}, {pipeline_mode = #tpu.pipeline_mode<synchronous>, transform_indices = @transform_3, window_bounds = array<i64: 1, 32>}, {pipeline_mode = #tpu.pipeline_mode<synchronous>, transform_indices = @transform_4, window_bounds = array<i64: 16, 32>}, {pipeline_mode = #tpu.pipeline_mode<synchronous>, transform_indices = @transform_5, window_bounds = array<i64: 1, 32>}, {pipeline_mode = #tpu.pipeline_mode<synchronous>, transform_indices = @transform_6, window_bounds = array<i64: 32, 32>}, {pipeline_mode = #tpu.pipeline_mode<synchronous>, transform_indices = @transform_7, window_bounds = array<i64: 32, 32>}, {pipeline_mode = #tpu.pipeline_mode<synchronous>, transform_indices = @transform_8, window_bounds = array<i64: 1, 32>}, {pipeline_mode = #tpu.pipeline_mode<synchronous>, transform_indices = @transform_9, window_bounds = array<i64: 32, 128>}, {pipeline_mode = #tpu.pipeline_mode<synchronous>, transform_indices = @transform_10, window_bounds = array<i64: 1, 128>}, {transform_indices = @transform_11, window_bounds = array<i64: 128, 128>}]} {
    %c0 = arith.constant 0 : index
    %c0_0 = arith.constant 0 : index
    %0 = vector.load %arg1[%c0, %c0_0] : memref<128x32xf32, #tpu.memory_space<vmem>>, vector<128x32xf32>
    %c0_1 = arith.constant 0 : index
    %c0_2 = arith.constant 0 : index
    %1 = vector.load %arg2[%c0_1, %c0_2] : memref<128x16xf32, #tpu.memory_space<vmem>>, vector<128x16xf32>
    %c0_3 = arith.constant 0 : index
    %c0_4 = arith.constant 0 : index
    %2 = vector.load %arg3[%c0_3, %c0_4] : memref<32x32xf32, #tpu.memory_space<vmem>>, vector<32x32xf32>
    %cst = arith.constant dense<0.000000e+00> : vector<128x32xf32>
    %3 = tpu.matmul %0, %2, %cst {dimension_numbers = #tpu.dot_dimension_numbers<[1], [0], [0], [1], [0, 0, 1, 1], [], []>} : vector<128x32xf32>, vector<32x32xf32>, vector<128x32xf32> -> vector<128x32xf32>
    %c0_5 = arith.constant 0 : index
    %c0_6 = arith.constant 0 : index
    %4 = vector.load %arg4[%c0_5, %c0_6] : memref<1x32xf32, #tpu.memory_space<vmem>>, vector<1x32xf32>
    %5 = vector.broadcast %4 : vector<1x32xf32> to vector<128x32xf32>
    %6 = arith.addf %3, %5 : vector<128x32xf32>
    %c0_7 = arith.constant 0 : index
    %c0_8 = arith.constant 0 : index
    %7 = vector.load %arg5[%c0_7, %c0_8] : memref<16x32xf32, #tpu.memory_space<vmem>>, vector<16x32xf32>
    %cst_9 = arith.constant dense<0.000000e+00> : vector<128x32xf32>
    %8 = tpu.matmul %1, %7, %cst_9 {dimension_numbers = #tpu.dot_dimension_numbers<[1], [0], [0], [1], [0, 0, 1, 1], [], []>} : vector<128x16xf32>, vector<16x32xf32>, vector<128x32xf32> -> vector<128x32xf32>
    %c0_10 = arith.constant 0 : index
    %c0_11 = arith.constant 0 : index
    %9 = vector.load %arg6[%c0_10, %c0_11] : memref<1x32xf32, #tpu.memory_space<vmem>>, vector<1x32xf32>
    %10 = vector.broadcast %9 : vector<1x32xf32> to vector<128x32xf32>
    %11 = arith.addf %8, %10 : vector<128x32xf32>
    %12 = math.tanh %6 : vector<128x32xf32>
    %13 = math.tanh %11 : vector<128x32xf32>
    %c0_12 = arith.constant 0 : index
    %c0_13 = arith.constant 0 : index
    %14 = vector.load %arg7[%c0_12, %c0_13] : memref<32x32xf32, #tpu.memory_space<vmem>>, vector<32x32xf32>
    %cst_14 = arith.constant dense<0.000000e+00> : vector<128x32xf32>
    %15 = tpu.matmul %12, %14, %cst_14 {dimension_numbers = #tpu.dot_dimension_numbers<[1], [0], [0], [1], [0, 0, 1, 1], [], []>} : vector<128x32xf32>, vector<32x32xf32>, vector<128x32xf32> -> vector<128x32xf32>
    %c0_15 = arith.constant 0 : index
    %c0_16 = arith.constant 0 : index
    %16 = vector.load %arg8[%c0_15, %c0_16] : memref<32x32xf32, #tpu.memory_space<vmem>>, vector<32x32xf32>
    %cst_17 = arith.constant dense<0.000000e+00> : vector<128x32xf32>
    %17 = tpu.matmul %13, %16, %cst_17 {dimension_numbers = #tpu.dot_dimension_numbers<[1], [0], [0], [1], [0, 0, 1, 1], [], []>} : vector<128x32xf32>, vector<32x32xf32>, vector<128x32xf32> -> vector<128x32xf32>
    %18 = arith.addf %15, %17 : vector<128x32xf32>
    %c0_18 = arith.constant 0 : index
    %c0_19 = arith.constant 0 : index
    %19 = vector.load %arg9[%c0_18, %c0_19] : memref<1x32xf32, #tpu.memory_space<vmem>>, vector<1x32xf32>
    %20 = vector.broadcast %19 : vector<1x32xf32> to vector<128x32xf32>
    %21 = arith.addf %18, %20 : vector<128x32xf32>
    %22 = math.tanh %21 : vector<128x32xf32>
    %c0_20 = arith.constant 0 : index
    %c0_21 = arith.constant 0 : index
    %23 = vector.load %arg10[%c0_20, %c0_21] : memref<32x128xf32, #tpu.memory_space<vmem>>, vector<32x128xf32>
    %cst_22 = arith.constant dense<0.000000e+00> : vector<128x128xf32>
    %24 = tpu.matmul %22, %23, %cst_22 {dimension_numbers = #tpu.dot_dimension_numbers<[1], [0], [0], [1], [0, 0, 1, 1], [], []>} : vector<128x32xf32>, vector<32x128xf32>, vector<128x128xf32> -> vector<128x128xf32>
    %c0_23 = arith.constant 0 : index
    %c0_24 = arith.constant 0 : index
    %25 = vector.load %arg11[%c0_23, %c0_24] : memref<1x128xf32, #tpu.memory_space<vmem>>, vector<1x128xf32>
    %26 = vector.broadcast %25 : vector<1x128xf32> to vector<128x128xf32>
    %27 = arith.addf %24, %26 : vector<128x128xf32>
    %28 = arith.negf %27 : vector<128x128xf32>
    %29 = math.exp %28 : vector<128x128xf32>
    %cst_25 = arith.constant 1.000000e+00 : f32
    %30 = vector.broadcast %cst_25 : f32 to vector<128x128xf32>
    %31 = arith.addf %30, %29 : vector<128x128xf32>
    %32 = arith.divf %30, %31 : vector<128x128xf32>
    %c0_26 = arith.constant 0 : index
    %c0_27 = arith.constant 0 : index
    %33 = vector.load %arg12[%c0_26, %c0_27] : memref<128x128xf32, #tpu.memory_space<vmem>>, vector<128x128xf32>
    tpu.vector_store %arg12[%c0_26, %c0_27], %32 {strides = array<i32>} : memref<128x128xf32, #tpu.memory_space<vmem>>, vector<128x128xf32>,
    return
  }
  func.func @transform_0(%arg0: i32) -> (i32, i32) {
    %c0_i32 = arith.constant 0 : i32
    %c0_i32_0 = arith.constant 0 : i32
    return %arg0, %c0_i32 : i32, i32
  }
  func.func @transform_1(%arg0: i32) -> (i32, i32) {
    %c0_i32 = arith.constant 0 : i32
    %c0_i32_0 = arith.constant 0 : i32
    return %arg0, %c0_i32 : i32, i32
  }
  func.func @transform_2(%arg0: i32) -> (i32, i32) {
    %c0_i32 = arith.constant 0 : i32
    %c0_i32_0 = arith.constant 0 : i32
    %c0_i32_1 = arith.constant 0 : i32
    return %c0_i32, %c0_i32_0 : i32, i32
  }
  func.func @transform_3(%arg0: i32) -> (i32, i32) {
    %c0_i32 = arith.constant 0 : i32
    %c0_i32_0 = arith.constant 0 : i32
    %c0_i32_1 = arith.constant 0 : i32
    return %c0_i32, %c0_i32_0 : i32, i32
  }
  func.func @transform_4(%arg0: i32) -> (i32, i32) {
    %c0_i32 = arith.constant 0 : i32
    %c0_i32_0 = arith.constant 0 : i32
    %c0_i32_1 = arith.constant 0 : i32
    return %c0_i32, %c0_i32_0 : i32, i32
  }
  func.func @transform_5(%arg0: i32) -> (i32, i32) {
    %c0_i32 = arith.constant 0 : i32
    %c0_i32_0 = arith.constant 0 : i32
    %c0_i32_1 = arith.constant 0 : i32
    return %c0_i32, %c0_i32_0 : i32, i32
  }
  func.func @transform_6(%arg0: i32) -> (i32, i32) {
    %c0_i32 = arith.constant 0 : i32
    %c0_i32_0 = arith.constant 0 : i32
    %c0_i32_1 = arith.constant 0 : i32
    return %c0_i32, %c0_i32_0 : i32, i32
  }
  func.func @transform_7(%arg0: i32) -> (i32, i32) {
    %c0_i32 = arith.constant 0 : i32
    %c0_i32_0 = arith.constant 0 : i32
    %c0_i32_1 = arith.constant 0 : i32
    return %c0_i32, %c0_i32_0 : i32, i32
  }
  func.func @transform_8(%arg0: i32) -> (i32, i32) {
    %c0_i32 = arith.constant 0 : i32
    %c0_i32_0 = arith.constant 0 : i32
    %c0_i32_1 = arith.constant 0 : i32
    return %c0_i32, %c0_i32_0 : i32, i32
  }
  func.func @transform_9(%arg0: i32) -> (i32, i32) {
    %c0_i32 = arith.constant 0 : i32
    %c0_i32_0 = arith.constant 0 : i32
    %c0_i32_1 = arith.constant 0 : i32
    return %c0_i32, %c0_i32_0 : i32, i32
  }
  func.func @transform_10(%arg0: i32) -> (i32, i32) {
    %c0_i32 = arith.constant 0 : i32
    %c0_i32_0 = arith.constant 0 : i32
    %c0_i32_1 = arith.constant 0 : i32
    return %c0_i32, %c0_i32_0 : i32, i32
  }
  func.func @transform_11(%arg0: i32) -> (i32, i32) {
    %c0_i32 = arith.constant 0 : i32
    %c0_i32_0 = arith.constant 0 : i32
    return %arg0, %c0_i32 : i32, i32
  }
}

</mosaic_0001>

<bundles_post_ra>
// kernel: explainer_forward.1
= control target key start
LH: loop header
LB: loop body
LE: loop exit
PB: predicated region body
PF: predicated region fallthrough
CT: control target
= control target key end

     0   :  { %16 = vsyncpa [#allocation3], 0  ;;  %vm82_vm0 = vcmask 261120   ;;  %vm285_vm1 = vcmask 130048   ;;  %s2205_s0 = inlined_call_operand.vmem [shape: f32[8,32], index: 0, kind: input, shape index: {}]   ;;  %s2206_s1 = inlined_call_operand.vmem [shape: f32[8,16], index: 1, kind: input, shape index: {}]   ;;  %s2207_s2 = inlined_call_operand.vmem [shape: f32[32,32], index: 2, kind: input, shape index: {}]   ;;  %s2208_s3 = inlined_call_operand.vmem [shape: f32[1,32], index: 3, kind: input, shape index: {}]   ;;  %s2209_s4 = inlined_call_operand.vmem [shape: f32[16,32], index: 4, kind: input, shape index: {}]   ;;  %s2210_s5 = inlined_call_operand.vmem [shape: f32[1,32], index: 5, kind: input, shape index: {}]   ;;  %s2211_s6 = inlined_call_operand.vmem [shape: f32[32,32], index: 6, kind: input, shape index: {}]   ;;  %s2212_s7 = inlined_call_operand.vmem [shape: f32[32,32], index: 7, kind: input, shape index: {}]   ;;  %s2213_s8 = inlined_call_operand.vmem [shape: f32[1,32], index: 8, kind: input, shape index: {}]   ;;  %s2214_s9 = inlined_call_operand.vmem [shape: f32[32,128], index: 9, kind: input, shape index: {}]   ;;  %s2215_s10 = inlined_call_operand.vmem [shape: f32[1,128], index: 10, kind: input, shape index: {}]   ;;  %s2216_s11 = inlined_call_operand.hbm [shape: f32[8,128], index: 11, kind: output, shape index: {}]  }
   0x1   :  { %v74_v0 = vld [vmem:[%s2207_s2 + $0x18] sm:$0xff]  ;;  %v73_v1 = vld [vmem:[%s2207_s2 + $0x10] sm:$0xff]  ;;  %v39_v2 = vld [vmem:[%s2205_s0] sm:$0xff] }
   0x2   :  { %1474 = vmatprep.subr.mxu0 %v74_v0  ;;  %v72_v3 = vld [vmem:[%s2207_s2 + $0x8] sm:$0xff]  ;;  %1482 = vmatprep.mubr.msk.f32.mxu0 %vm82_vm0, %v39_v2  ;;  %v71_v5 = vld [vmem:[%s2207_s2] sm:$0xff]  ;;  %v41_v8 = vld [vmem:[%s2205_s0 + $0x10] sm:$0xff] }
   0x3   :  { %1475 = vmatpush3.msra.mxu0 %v74_v0  ;;  %v277_v4 = vld [vmem:[%s2209_s4 + $0x8] sm:$0xff]  ;;  %v276_v6 = vld [vmem:[%s2209_s4] sm:$0xff]  ;;  %v61_v9 = vld [vmem:[%s2206_s1 + $0x30] sm:$0xff] }
   0x4   :  { %1476 = vmatprep.subr.mxu0 %v73_v1  ;;  %1630 = vmatprep.subr.mxu1 %v277_v4  ;;  %v40_v7 = vld [vmem:[%s2205_s0 + $0x8] sm:$0xff]  ;;  %v42_v10 = vld [vmem:[%s2205_s0 + $0x18] sm:$0xff]  ;;  %v63_v12 = vld [vmem:[%s2206_s1 + $0x40] sm:$0xff] }
   0x5   :  { %1477 = vmatpush3.msra.mxu0 %v73_v1  ;;  %1632 = vmatpush3.msra.mxu1 %v277_v4  ;;  %v62_v11 = vld [vmem:[%s2206_s1 + $0x38] sm:$0xff]  ;;  %v43_v13 = vld [vmem:[%s2205_s0 + $0x20] sm:$0xff]  ;;  %v64_v14 = vld [vmem:[%s2206_s1 + $0x48] sm:$0xff] }
   0x6   :  { %1478 = vmatprep.subr.mxu0 %v72_v3  ;;  %1631 = vmatprep.subr.mxu1 %v276_v6  ;;  %v44_v15 = vld [vmem:[%s2205_s0 + $0x28] sm:$0xff]  ;;  %v65_v16 = vld [vmem:[%s2206_s1 + $0x50] sm:$0xff]  ;;  %v66_v18 = vld [vmem:[%s2206_s1 + $0x58] sm:$0xff] }
   0x7   :  { %1479 = vmatpush3.msra.mxu0 %v72_v3  ;;  %1633 = vmatpush3.msra.mxu1 %v276_v6  ;;  %v45_v17 = vld [vmem:[%s2205_s0 + $0x30] sm:$0xff]  ;;  %v46_v19 = vld [vmem:[%s2205_s0 + $0x38] sm:$0xff]  ;;  %v67_v20 = vld [vmem:[%s2206_s1 + $0x60] sm:$0xff] }
   0x8   :  { %1480 = vmatprep.subr.mxu0 %v71_v5  ;;  %1519 = vmatprep.mubr.msk.f32.mxu1 %vm285_vm1, %v61_v9  ;;  %v47_v21 = vld [vmem:[%s2205_s0 + $0x40] sm:$0xff]  ;;  %v68_v22 = vld [vmem:[%s2206_s1 + $0x68] sm:$0xff]  ;;  %v69_v24 = vld [vmem:[%s2206_s1 + $0x70] sm:$0xff] }
   0x9   :  { %1481 = vmatpush3.msra.mxu0 %v71_v5  ;;  %1520 = vmatmul.mubr.msk.f32.vlgmr.msra.gmra.mxu1 %vm285_vm1, %v62_v11  ;;  %v48_v23 = vld [vmem:[%s2205_s0 + $0x48] sm:$0xff]  ;;  %v49_v25 = vld [vmem:[%s2205_s0 + $0x50] sm:$0xff]  ;;  %v70_v26 = vld [vmem:[%s2206_s1 + $0x78] sm:$0xff] }
   0xa   :  { %1483 = vmatmul.mubr.msk.f32.vlgmr.msra.gmra.mxu0 %vm82_vm0, %v40_v7  ;;  %1506 = vmatprep.subr.mxu0 %v277_v4  ;;  %v50_v27 = vld [vmem:[%s2205_s0 + $0x58] sm:$0xff]  ;;  %v51_v28 = vld [vmem:[%s2205_s0 + $0x60] sm:$0xff]  ;;  %v52_v29 = vld [vmem:[%s2205_s0 + $0x68] sm:$0xff] }
   0xb   :  { %1507 = vmatpush3.msra.mxu0 %v277_v4  ;;  %1485 = vmatprep.mubr.msk.f32.mxu0 %vm82_vm0, %v41_v8  ;;  %v53_v30 = vld [vmem:[%s2205_s0 + $0x70] sm:$0xff]  ;;  %v54_v31 = vld [vmem:[%s2205_s0 + $0x78] sm:$0xff]  ;;  %v55_v32 = vld [vmem:[%s2206_s1] sm:$0xff] }
   0xc   :  { %1508 = vmatprep.subr.mxu0 %v276_v6  ;;  %1522 = vmatprep.mubr.msk.f32.mxu1 %vm285_vm1, %v63_v12  ;;  %v56_v33 = vld [vmem:[%s2206_s1 + $0x8] sm:$0xff]  ;;  %v57_v34 = vld [vmem:[%s2206_s1 + $0x10] sm:$0xff]  ;;  %v58_v35 = vld [vmem:[%s2206_s1 + $0x18] sm:$0xff] }
   0xd   :  { %1509 = vmatpush3.msra.mxu0 %v276_v6  ;;  %1523 = vmatmul.mubr.msk.f32.gmra.mxu1 %vm285_vm1, %v64_v14  ;;  %v59_v36 = vld [vmem:[%s2206_s1 + $0x20] sm:$0xff]  ;;  %v60_v37 = vld [vmem:[%s2206_s1 + $0x28] sm:$0xff]  ;;  %v514_v38 = vld [vmem:[%s2211_s6 + $0x18] sm:$0xff] }
   0xe   :  { %1486 = vmatmul.mubr.msk.f32.gmra.mxu0 %vm82_vm0, %v42_v10  ;;  %1525 = vmatprep.mubr.msk.f32.mxu1 %vm285_vm1, %v65_v16  ;;  %v513_v39 = vld [vmem:[%s2211_s6 + $0x10] sm:$0xff]  ;;  %v512_v40 = vld [vmem:[%s2211_s6 + $0x8] sm:$0xff]  ;;  %v511_v41 = vld [vmem:[%s2211_s6] sm:$0xff] }
   0xf   :  { %1488 = vmatprep.mubr.msk.f32.mxu0 %vm82_vm0, %v43_v13  ;;  %1566 = vmatprep.subr.mxu0 %v514_v38  ;;  %v518_v42 = vld [vmem:[%s2212_s7 + $0x18] sm:$0xff]  ;;  %v517_v43 = vld [vmem:[%s2212_s7 + $0x10] sm:$0xff]  ;;  %v516_v44 = vld [vmem:[%s2212_s7 + $0x8] sm:$0xff] }
  0x10   :  { %1534 = vmatprep.subr.mxu1 %v518_v42  ;;  %v515_v45 = vld [vmem:[%s2212_s7] sm:$0xff] }
  0x11   :  { %1526 = vmatmul.mubr.msk.f32.gmra.mxu1 %vm285_vm1, %v66_v18  ;;  %v2055_v46 = vld [vmem:[%s2208_s3] ss:$0 sm:$0xff] }
  0x12   :  { %1489 = vmatmul.mubr.msk.f32.gmra.mxu0 %vm82_vm0, %v44_v15  ;;  %1528 = vmatprep.mubr.msk.f32.mxu1 %vm285_vm1, %v67_v20 }
  0x13   :  { %1491 = vmatprep.mubr.msk.f32.mxu0 %vm82_vm0, %v45_v17  ;;  %1535 = vmatpush3.msra.mxu1 %v518_v42 }
  0x14   :  { %1536 = vmatprep.subr.mxu1 %v517_v43 }
  0x15   :  { %1529 = vmatmul.mubr.msk.f32.gmra.mxu1 %vm285_vm1, %v68_v22 }
  0x16   :  { %1492 = vmatmul.mubr.msk.f32.gmra.mxu0 %vm82_vm0, %v46_v19  ;;  %1531 = vmatprep.mubr.msk.f32.mxu1 %vm285_vm1, %v69_v24 }
  0x17   :  { %1494 = vmatprep.mubr.msk.f32.mxu0 %vm82_vm0, %v47_v21  ;;  %1537 = vmatpush3.msra.mxu1 %v517_v43 }
  0x18   :  { %1538 = vmatprep.subr.mxu1 %v516_v44 }
  0x19   :  { %1532 = vmatmul.mubr.msk.f32.gmra.mxu1 %vm285_vm1, %v70_v26 }
  0x1a   :  { %1495 = vmatmul.mubr.msk.f32.gmra.mxu0 %vm82_vm0, %v48_v23  ;;  %1539 = vmatpush3.msra.mxu1 %v516_v44 }
  0x1b   :  { %1497 = vmatprep.mubr.msk.f32.mxu0 %vm82_vm0, %v49_v25  ;;  %1540 = vmatprep.subr.mxu1 %v515_v45 }
  0x1c   :  { %1541 = vmatpush3.msra.mxu1 %v515_v45 }
  0x1e   :  { %1498 = vmatmul.mubr.msk.f32.gmra.mxu0 %vm82_vm0, %v50_v27  ;;  %v2087_v27 = vld [vmem:[%s2210_s5] ss:$0 sm:$0xff] }
  0x1f   :  { %1500 = vmatprep.mubr.msk.f32.mxu0 %vm82_vm0, %v51_v28 }
  0x22   :  { %1501 = vmatmul.mubr.msk.f32.gmra.mxu0 %vm82_vm0, %v52_v29 }
  0x23   :  { %1503 = vmatprep.mubr.msk.f32.mxu0 %vm82_vm0, %v53_v30 }
  0x26   :  { %1504 = vmatmul.mubr.msk.f32.gmra.mxu0 %vm82_vm0, %v54_v31 }
  0x27   :  { %1510 = vmatprep.mubr.msk.f32.mxu0 %vm285_vm1, %v55_v32 }
  0x2a   :  { %1511 = vmatmul.mubr.msk.f32.vlgmr.msra.gmra.mxu0 %vm285_vm1, %v56_v33 }
  0x2b   :  { %1513 = vmatprep.mubr.msk.f32.mxu0 %vm285_vm1, %v57_v34  ;;  %1567 = vmatpush3.msra.mxu0 %v514_v38 }
  0x2c   :  { %1568 = vmatprep.subr.mxu0 %v513_v39 }
  0x2d   :  { %1569 = vmatpush3.msra.mxu0 %v513_v39 }
  0x2e   :  { %1514 = vmatmul.mubr.msk.f32.gmra.mxu0 %vm285_vm1, %v58_v35  ;;  %1570 = vmatprep.subr.mxu0 %v512_v40 }
  0x2f   :  { %1516 = vmatprep.mubr.msk.f32.mxu0 %vm285_vm1, %v59_v36  ;;  %1571 = vmatpush3.msra.mxu0 %v512_v40 }
  0x30   :  { %1572 = vmatprep.subr.mxu0 %v511_v41 }
  0x31   :  { %1573 = vmatpush3.msra.mxu0 %v511_v41 }
  0x32   :  { %1517 = vmatmul.mubr.msk.f32.gmra.mxu0 %vm285_vm1, %v60_v37 }
  0xc9   :  { %v2066_v3 = vpop.f32.mrf.mxu1 }
  0xca   :  { %v1484_v47 = vpop.f32.mrf.mxu0 }
  0xcb   :  { %v203_v48 = vadd.f32 %v1484_v47, %v2055_v46  ;;  %v430_v10 = vpop.f32.mrf.mxu1 }
  0xcc   :  { %v197_v49 = vpop.f32.mrf.mxu0  ;;  %v431_v43 = vadd.f32 %v2087_v27, %v430_v10 }
  0xcd   :  { %v198_v50 = vadd.f32 %v2055_v46, %v197_v49  ;;  %v2076_v17 = vpop.f32.mrf.mxu1 }
  0xce   :  { %v1487_v51 = vpop.f32.mrf.mxu0 }
  0xcf   :  { %1637 = vtanh.f32 %v198_v50  ;;  %v213_v52 = vadd.f32 %v1487_v51, %v2055_v46  ;;  %v440_v24 = vpop.f32.mrf.mxu1 }
  0xd0   :  { %1639 = vtanh.f32 %v203_v48  ;;  %v207_v53 = vpop.f32.mrf.mxu0  ;;  %v441_v50 = vadd.f32 %v2087_v27, %v440_v24 }
  0xd1   :  { %v208_v54 = vadd.f32 %v2055_v46, %v207_v53  ;;  %v1527_v32 = vpop.f32.mrf.mxu1 }
  0xd2   :  { %v1490_v55 = vpop.f32.mrf.mxu0 }
  0xd3   :  { %1641 = vtanh.f32 %v208_v54  ;;  %v223_v56 = vadd.f32 %v1490_v55, %v2055_v46  ;;  %v450_v39 = vpop.f32.mrf.mxu1 }
  0xd4   :  { %1643 = vtanh.f32 %v213_v52  ;;  %v217_v57 = vpop.f32.mrf.mxu0  ;;  %v436_v52 = vadd.f32 %v2066_v3, %v2087_v27  ;;  %v451_v55 = vadd.f32 %v2087_v27, %v450_v39 }
  0xd5   :  { %v218_v58 = vadd.f32 %v2055_v46, %v217_v57  ;;  %v1530_v47 = vpop.f32.mrf.mxu1  ;;  %v446_v57 = vadd.f32 %v2076_v17, %v2087_v27  ;;  %v946_v17 = vld [vmem:[%s2214_s9 + $0x10] sm:$0xff] }
  0xd6   :  { %v1493_v59 = vpop.f32.mrf.mxu0 }
  0xd7   :  { %1645 = vtanh.f32 %v218_v58  ;;  %v233_v60 = vadd.f32 %v1493_v59, %v2055_v46  ;;  %v460_v53 = vpop.f32.mrf.mxu1 }
  0xd8   :  { %1647 = vtanh.f32 %v223_v56  ;;  %v227_v61 = vpop.f32.mrf.mxu0 }
  0xd9   :  { %v228_v62 = vadd.f32 %v2055_v46, %v227_v61  ;;  %v1533_v58 = vpop.f32.mrf.mxu1 }
  0xda   :  { %v1496_v63 = vpop.f32.mrf.mxu0 }
  0xdb   :  { %1649 = vtanh.f32 %v228_v62  ;;  %v243_v1 = vadd.f32 %v1496_v63, %v2055_v46  ;;  %v456_v62 = vadd.f32 %v1527_v32, %v2087_v27  ;;  %v470_v63 = vpop.f32.mrf.mxu1 }
  0xdc   :  { %v1638_v0 = vpop.eup %1637  ;;  %1651 = vtanh.f32 %v233_v60  ;;  %v237_v2 = vpop.f32.mrf.mxu0  ;;  %v461_v60 = vadd.f32 %v2087_v27, %v460_v53 }
  0xdd   :  { %v1640_v4 = vpop.eup %1639  ;;  %v238_v5 = vadd.f32 %v2055_v46, %v237_v2  ;;  %1574 = vmatprep.mubr.msk.f32.mxu0 %vm82_vm0, %v1638_v0  ;;  %v471_v2 = vadd.f32 %v2087_v27, %v470_v63 }
  0xde   :  { %v1499_v6 = vpop.f32.mrf.mxu0  ;;  %1575 = vmatmul.mubr.msk.f32.vlgmr.msra.gmra.mxu0 %vm82_vm0, %v1640_v4  ;;  %v466_v4 = vadd.f32 %v1530_v47, %v2087_v27 }
  0xdf   :  { %1653 = vtanh.f32 %v238_v5  ;;  %v253_v8 = vadd.f32 %v1499_v6, %v2055_v46 }
  0xe0   :  { %v1642_v7 = vpop.eup %1641  ;;  %1655 = vtanh.f32 %v243_v1  ;;  %v247_v9 = vpop.f32.mrf.mxu0 }
  0xe1   :  { %v1644_v11 = vpop.eup %1643  ;;  %v248_v12 = vadd.f32 %v2055_v46, %v247_v9  ;;  %1577 = vmatprep.mubr.msk.f32.mxu0 %vm82_vm0, %v1642_v7  ;;  %v476_v7 = vadd.f32 %v1533_v58, %v2087_v27 }
  0xe2   :  { %v1502_v13 = vpop.f32.mrf.mxu0  ;;  %1578 = vmatmul.mubr.msk.f32.gmra.mxu0 %vm82_vm0, %v1644_v11 }
  0xe3   :  { %1657 = vtanh.f32 %v248_v12  ;;  %v263_v15 = vadd.f32 %v1502_v13, %v2055_v46 }
  0xe4   :  { %v1646_v14 = vpop.eup %1645  ;;  %1659 = vtanh.f32 %v253_v8  ;;  %v257_v16 = vpop.f32.mrf.mxu0 }
  0xe5   :  { %v1648_v18 = vpop.eup %1647  ;;  %v258_v19 = vadd.f32 %v2055_v46, %v257_v16  ;;  %1580 = vmatprep.mubr.msk.f32.mxu0 %vm82_vm0, %v1646_v14  ;;  %v947_v16 = vld [vmem:[%s2214_s9 + $0x18] sm:$0xff] }
  0xe6   :  { %v1505_v20 = vpop.f32.mrf.mxu0  ;;  %1581 = vmatmul.mubr.msk.f32.gmra.mxu0 %vm82_vm0, %v1648_v18  ;;  %1598 = vmatprep.subr.mxu1 %v947_v16  ;;  %v945_v18 = vld [vmem:[%s2214_s9 + $0x8] sm:$0xff] }
  0xe7   :  { %1661 = vtanh.f32 %v258_v19  ;;  %v273_v22 = vadd.f32 %v1505_v20, %v2055_v46  ;;  %v944_v19 = vld [vmem:[%s2214_s9] sm:$0xff] }
  0xe8   :  { %v1650_v21 = vpop.eup %1649  ;;  %1663 = vtanh.f32 %v263_v15  ;;  %v267_v23 = vpop.f32.mrf.mxu0 }
  0xe9   :  { %v1652_v25 = vpop.eup %1651  ;;  %v268_v26 = vadd.f32 %v2055_v46, %v267_v23  ;;  %1583 = vmatprep.mubr.msk.f32.mxu0 %vm82_vm0, %v1650_v21 }
  0xea   :  { %v1512_v28 = vpop.f32.mrf.mxu0  ;;  %1584 = vmatmul.mubr.msk.f32.gmra.mxu0 %vm82_vm0, %v1652_v25 }
  0xeb   :  { %1665 = vtanh.f32 %v268_v26  ;;  %v406_v30 = vadd.f32 %v1512_v28, %v2087_v27 }
  0xec   :  { %v1654_v29 = vpop.eup %1653  ;;  %1667 = vtanh.f32 %v273_v22  ;;  %v400_v31 = vpop.f32.mrf.mxu0 }
  0xed   :  { %v1656_v33 = vpop.eup %1655  ;;  %v401_v34 = vadd.f32 %v2087_v27, %v400_v31  ;;  %1586 = vmatprep.mubr.msk.f32.mxu0 %vm82_vm0, %v1654_v29 }
  0xee   :  { %v1515_v35 = vpop.f32.mrf.mxu0  ;;  %1587 = vmatmul.mubr.msk.f32.gmra.mxu0 %vm82_vm0, %v1656_v33 }
  0xef   :  { %1669 = vtanh.f32 %v401_v34  ;;  %v416_v37 = vadd.f32 %v1515_v35, %v2087_v27 }
  0xf0   :  { %v1658_v36 = vpop.eup %1657  ;;  %1671 = vtanh.f32 %v406_v30  ;;  %v410_v38 = vpop.f32.mrf.mxu0  ;;  %v2147_v30 = vld [vmem:[%s2213_s8] ss:$0 sm:$0xff] }
  0xf1   :  { %v1660_v40 = vpop.eup %1659  ;;  %v411_v41 = vadd.f32 %v2087_v27, %v410_v38  ;;  %1589 = vmatprep.mubr.msk.f32.mxu0 %vm82_vm0, %v1658_v36 }
  0xf2   :  { %v1518_v42 = vpop.f32.mrf.mxu0  ;;  %1590 = vmatmul.mubr.msk.f32.gmra.mxu0 %vm82_vm0, %v1660_v40 }
  0xf3   :  { %1673 = vtanh.f32 %v411_v41  ;;  %v426_v45 = vadd.f32 %v1518_v42, %v2087_v27 }
  0xf4   :  { %v1662_v44 = vpop.eup %1661  ;;  %1675 = vtanh.f32 %v416_v37  ;;  %v420_v46 = vpop.f32.mrf.mxu0 }
  0xf5   :  { %v1664_v48 = vpop.eup %1663  ;;  %v421_v49 = vadd.f32 %v2087_v27, %v420_v46  ;;  %1592 = vmatprep.mubr.msk.f32.mxu0 %vm82_vm0, %v1662_v44  ;;  %1677 = vtanh.f32 %v431_v43 }
  0xf6   :  { %1593 = vmatmul.mubr.msk.f32.gmra.mxu0 %vm82_vm0, %v1664_v48 }
  0xf7   :  { %1679 = vtanh.f32 %v421_v49 }
  0xf8   :  { %v1666_v51 = vpop.eup %1665  ;;  %1681 = vtanh.f32 %v426_v45 }
  0xf9   :  { %v1668_v54 = vpop.eup %1667  ;;  %1595 = vmatprep.mubr.msk.f32.mxu0 %vm82_vm0, %v1666_v51  ;;  %1683 = vtanh.f32 %v441_v50 }
  0xfa   :  { %1596 = vmatmul.mubr.msk.f32.gmra.mxu0 %vm82_vm0, %v1668_v54  ;;  %1685 = vtanh.f32 %v436_v52 }
  0xfb   :  { %1687 = vtanh.f32 %v451_v55 }
  0xfc   :  { %v1670_v56 = vpop.eup %1669  ;;  %1689 = vtanh.f32 %v446_v57 }
  0xfd   :  { %v1672_v59 = vpop.eup %1671  ;;  %1542 = vmatprep.mubr.msk.f32.mxu1 %vm82_vm0, %v1670_v56  ;;  %1691 = vtanh.f32 %v461_v60 }
  0xfe   :  { %1543 = vmatmul.mubr.msk.f32.vlgmr.msra.gmra.mxu1 %vm82_vm0, %v1672_v59  ;;  %1693 = vtanh.f32 %v456_v62 }
  0xff   :  { %1695 = vtanh.f32 %v471_v2  ;;  %1599 = vmatpush3.msra.mxu1 %v947_v16 }
 0x100   :  { %v1674_v61 = vpop.eup %1673  ;;  %1697 = vtanh.f32 %v466_v4  ;;  %1600 = vmatprep.subr.mxu1 %v946_v17 }
 0x101   :  { %v1676_v0 = vpop.eup %1675  ;;  %1545 = vmatprep.mubr.msk.f32.mxu1 %vm82_vm0, %v1674_v61  ;;  %1699 = vtanh.f32 %v476_v7  ;;  %1601 = vmatpush3.msra.mxu1 %v946_v17 }
 0x102   :  { %1546 = vmatmul.mubr.msk.f32.gmra.mxu1 %vm82_vm0, %v1676_v0  ;;  %v1678_v1 = vpop.eup %1677  ;;  %1602 = vmatprep.subr.mxu1 %v945_v18 }
 0x103   :  { %1603 = vmatpush3.msra.mxu1 %v945_v18 }
 0x104   :  { %v1680_v3 = vpop.eup %1679  ;;  %1604 = vmatprep.subr.mxu1 %v944_v19 }
 0x105   :  { %v1682_v5 = vpop.eup %1681  ;;  %1548 = vmatprep.mubr.msk.f32.mxu1 %vm82_vm0, %v1680_v3  ;;  %1605 = vmatpush3.msra.mxu1 %v944_v19 }
 0x106   :  { %1549 = vmatmul.mubr.msk.f32.gmra.mxu1 %vm82_vm0, %v1682_v5  ;;  %v1684_v6 = vpop.eup %1683 }
 0x107   :  { %1551 = vmatprep.mubr.msk.f32.mxu1 %vm82_vm0, %v1678_v1  ;;  %v1686_v8 = vpop.eup %1685 }
 0x108   :  { %v1688_v9 = vpop.eup %1687 }
 0x109   :  { %v1690_v10 = vpop.eup %1689 }
 0x10a   :  { %1552 = vmatmul.mubr.msk.f32.gmra.mxu1 %vm82_vm0, %v1686_v8  ;;  %v1692_v11 = vpop.eup %1691 }
 0x10b   :  { %1554 = vmatprep.mubr.msk.f32.mxu1 %vm82_vm0, %v1684_v6  ;;  %v1694_v12 = vpop.eup %1693 }
 0x10c   :  { %v1696_v13 = vpop.eup %1695 }
 0x10d   :  { %v1698_v14 = vpop.eup %1697 }
 0x10e   :  { %1555 = vmatmul.mubr.msk.f32.gmra.mxu1 %vm82_vm0, %v1690_v10  ;;  %v1700_v15 = vpop.eup %1699 }
 0x10f   :  { %1557 = vmatprep.mubr.msk.f32.mxu1 %vm82_vm0, %v1688_v9 }
 0x112   :  { %1558 = vmatmul.mubr.msk.f32.gmra.mxu1 %vm82_vm0, %v1694_v12 }
 0x113   :  { %1560 = vmatprep.mubr.msk.f32.mxu1 %vm82_vm0, %v1692_v11 }
 0x116   :  { %1561 = vmatmul.mubr.msk.f32.gmra.mxu1 %vm82_vm0, %v1698_v14 }
 0x117   :  { %1563 = vmatprep.mubr.msk.f32.mxu1 %vm82_vm0, %v1696_v13 }
 0x11a   :  { %1564 = vmatmul.mubr.msk.f32.gmra.mxu1 %vm82_vm0, %v1700_v15 }
 0x19e   :  { %v1576_v20 = vpop.f32.mrf.mxu0 }
 0x1a0   :  { %v826_v21 = vpop.f32.mrf.mxu0 }
 0x1a2   :  { %v1579_v22 = vpop.f32.mrf.mxu0 }
 0x1a4   :  { %v836_v23 = vpop.f32.mrf.mxu0 }
 0x1a6   :  { %v1582_v24 = vpop.f32.mrf.mxu0 }
 0x1a8   :  { %v846_v25 = vpop.f32.mrf.mxu0 }
 0x1aa   :  { %v1585_v26 = vpop.f32.mrf.mxu0 }
 0x1ac   :  { %v856_v27 = vpop.f32.mrf.mxu0 }
 0x1ae   :  { %v1588_v31 = vpop.f32.mrf.mxu0 }
 0x1b0   :  { %v866_v38 = vpop.f32.mrf.mxu0 }
 0x1b2   :  { %v1591_v45 = vpop.f32.mrf.mxu0 }
 0x1b4   :  { %v876_v52 = vpop.f32.mrf.mxu0 }
 0x1b6   :  { %v1594_v59 = vpop.f32.mrf.mxu0 }
 0x1b8   :  { %v886_v4 = vpop.f32.mrf.mxu0 }
 0x1ba   :  { %v1597_v13 = vpop.f32.mrf.mxu0 }
 0x1be   :  { %v1544_v28 = vpop.f32.mrf.mxu1 }
 0x1bf   :  { %v832_v29 = vadd.f32 %v1576_v20, %v1544_v28 }
 0x1c0   :  { %v633_v32 = vpop.f32.mrf.mxu1 }
 0x1c1   :  { %v827_v33 = vadd.f32 %v826_v21, %v633_v32  ;;  %v913_v34 = vadd.f32 %v2147_v30, %v832_v29 }
 0x1c2   :  { %v1547_v35 = vpop.f32.mrf.mxu1 }
 0x1c3   :  { %v912_v36 = vadd.f32 %v2147_v30, %v827_v33  ;;  %v842_v37 = vadd.f32 %v1579_v22, %v1547_v35  ;;  %v896_v22 = vpop.f32.mrf.mxu0 }
 0x1c4   :  { %v643_v39 = vpop.f32.mrf.mxu1 }
 0x1c5   :  { %1701 = vtanh.f32 %v912_v36  ;;  %v837_v40 = vadd.f32 %v836_v23, %v643_v39  ;;  %v915_v41 = vadd.f32 %v2147_v30, %v842_v37  ;;  %v2184_v37 = vld [vmem:[%s2215_s10] ss:$0 sm:$0xff] }
 0x1c6   :  { %1703 = vtanh.f32 %v913_v34  ;;  %v1550_v42 = vpop.f32.mrf.mxu1 }
 0x1c7   :  { %v914_v43 = vadd.f32 %v2147_v30, %v837_v40  ;;  %v852_v44 = vadd.f32 %v1582_v24, %v1550_v42 }
 0x1c8   :  { %v653_v46 = vpop.f32.mrf.mxu1 }
 0x1c9   :  { %1705 = vtanh.f32 %v914_v43  ;;  %v847_v47 = vadd.f32 %v846_v25, %v653_v46  ;;  %v917_v48 = vadd.f32 %v2147_v30, %v852_v44 }
 0x1ca   :  { %1707 = vtanh.f32 %v915_v41  ;;  %v1553_v49 = vpop.f32.mrf.mxu1 }
 0x1cb   :  { %v916_v50 = vadd.f32 %v2147_v30, %v847_v47  ;;  %v862_v51 = vadd.f32 %v1585_v26, %v1553_v49 }
 0x1cc   :  { %v663_v53 = vpop.f32.mrf.mxu1 }
 0x1cd   :  { %1709 = vtanh.f32 %v916_v50  ;;  %v857_v54 = vadd.f32 %v856_v27, %v663_v53  ;;  %v919_v55 = vadd.f32 %v2147_v30, %v862_v51 }
 0x1ce   :  { %1711 = vtanh.f32 %v917_v48  ;;  %v1556_v56 = vpop.f32.mrf.mxu1 }
 0x1cf   :  { %v918_v57 = vadd.f32 %v2147_v30, %v857_v54  ;;  %v872_v58 = vadd.f32 %v1588_v31, %v1556_v56 }
 0x1d0   :  { %v673_v60 = vpop.f32.mrf.mxu1 }
 0x1d1   :  { %1713 = vtanh.f32 %v918_v57  ;;  %v867_v61 = vadd.f32 %v866_v38, %v673_v60  ;;  %v921_v63 = vadd.f32 %v2147_v30, %v872_v58 }
 0x1d2   :  { %v1702_v62 = vpop.eup %1701  ;;  %1715 = vtanh.f32 %v919_v55  ;;  %v1559_v0 = vpop.f32.mrf.mxu1 }
 0x1d3   :  { %v1704_v1 = vpop.eup %1703  ;;  %v920_v2 = vadd.f32 %v2147_v30, %v867_v61  ;;  %v882_v3 = vadd.f32 %v1591_v45, %v1559_v0  ;;  %1606 = vmatprep.mubr.msk.f32.mxu1 %vm82_vm0, %v1702_v62 }
 0x1d4   :  { %v683_v5 = vpop.f32.mrf.mxu1  ;;  %1607 = vmatmul.mubr.msk.f32.vlgmr.msra.gmra.mxu1 %vm82_vm0, %v1704_v1 }
 0x1d5   :  { %1717 = vtanh.f32 %v920_v2  ;;  %v877_v6 = vadd.f32 %v876_v52, %v683_v5  ;;  %v923_v8 = vadd.f32 %v2147_v30, %v882_v3 }
 0x1d6   :  { %v1706_v7 = vpop.eup %1705  ;;  %1719 = vtanh.f32 %v921_v63  ;;  %v1562_v9 = vpop.f32.mrf.mxu1 }
 0x1d7   :  { %v1708_v10 = vpop.eup %1707  ;;  %v922_v11 = vadd.f32 %v2147_v30, %v877_v6  ;;  %v892_v12 = vadd.f32 %v1594_v59, %v1562_v9  ;;  %1609 = vmatprep.mubr.msk.f32.mxu1 %vm82_vm0, %v1706_v7 }
 0x1d8   :  { %v693_v14 = vpop.f32.mrf.mxu1  ;;  %1610 = vmatmul.mubr.msk.f32.gmra.mxu1 %vm82_vm0, %v1708_v10 }
 0x1d9   :  { %1721 = vtanh.f32 %v922_v11  ;;  %v887_v15 = vadd.f32 %v886_v4, %v693_v14  ;;  %v925_v17 = vadd.f32 %v2147_v30, %v892_v12 }
 0x1da   :  { %v1710_v16 = vpop.eup %1709  ;;  %1723 = vtanh.f32 %v923_v8  ;;  %v1565_v18 = vpop.f32.mrf.mxu1 }
 0x1db   :  { %v1712_v19 = vpop.eup %1711  ;;  %v924_v20 = vadd.f32 %v2147_v30, %v887_v15  ;;  %v902_v21 = vadd.f32 %v1597_v13, %v1565_v18  ;;  %1612 = vmatprep.mubr.msk.f32.mxu1 %vm82_vm0, %v1710_v16 }
 0x1dc   :  { %v703_v23 = vpop.f32.mrf.mxu1  ;;  %1613 = vmatmul.mubr.msk.f32.gmra.mxu1 %vm82_vm0, %v1712_v19 }
 0x1dd   :  { %1725 = vtanh.f32 %v924_v20  ;;  %v897_v24 = vadd.f32 %v896_v22, %v703_v23  ;;  %v927_v26 = vadd.f32 %v2147_v30, %v902_v21 }
 0x1de   :  { %v1714_v25 = vpop.eup %1713  ;;  %1727 = vtanh.f32 %v925_v17 }
 0x1df   :  { %v1716_v27 = vpop.eup %1715  ;;  %v926_v28 = vadd.f32 %v2147_v30, %v897_v24  ;;  %1615 = vmatprep.mubr.msk.f32.mxu1 %vm82_vm0, %v1714_v25 }
 0x1e0   :  { %1616 = vmatmul.mubr.msk.f32.gmra.mxu1 %vm82_vm0, %v1716_v27 }
 0x1e1   :  { %1729 = vtanh.f32 %v926_v28 }
 0x1e2   :  { %v1718_v29 = vpop.eup %1717  ;;  %1731 = vtanh.f32 %v927_v26 }
 0x1e3   :  { %v1720_v31 = vpop.eup %1719  ;;  %1618 = vmatprep.mubr.msk.f32.mxu1 %vm82_vm0, %v1718_v29 }
 0x1e4   :  { %1619 = vmatmul.mubr.msk.f32.gmra.mxu1 %vm82_vm0, %v1720_v31 }
 0x1e6   :  { %v1722_v32 = vpop.eup %1721 }
 0x1e7   :  { %v1724_v33 = vpop.eup %1723  ;;  %1621 = vmatprep.mubr.msk.f32.mxu1 %vm82_vm0, %v1722_v32 }
 0x1e8   :  { %1622 = vmatmul.mubr.msk.f32.gmra.mxu1 %vm82_vm0, %v1724_v33 }
 0x1ea   :  { %v1726_v34 = vpop.eup %1725 }
 0x1eb   :  { %v1728_v30 = vpop.eup %1727  ;;  %1624 = vmatprep.mubr.msk.f32.mxu1 %vm82_vm0, %v1726_v34 }
 0x1ec   :  { %1625 = vmatmul.mubr.msk.f32.gmra.mxu1 %vm82_vm0, %v1728_v30 }
 0x1ee   :  { %v1730_v35 = vpop.eup %1729 }
 0x1ef   :  { %v1732_v36 = vpop.eup %1731  ;;  %1627 = vmatprep.mubr.msk.f32.mxu1 %vm82_vm0, %v1730_v35 }
 0x1f0   :  { %1628 = vmatmul.mubr.msk.f32.gmra.mxu1 %vm82_vm0, %v1732_v36 }
 0x294   :  { %v1608_v38 = vpop.f32.mrf.mxu1 }
 0x295   :  { %v1075_v39 = vadd.f32 %v1608_v38, %v2184_v37 }
 0x296   :  { %v1069_v40 = vpop.f32.mrf.mxu1 }
 0x297   :  { %v1361_v41 = vmul.f32 -1.442695, %v1075_v39  ;;  %v1070_v42 = vadd.f32 %v2184_v37, %v1069_v40 }
 0x298   :  { %v1611_v43 = vpop.f32.mrf.mxu1 }
 0x299   :  { %1733 = vpow2.f32 %v1361_v41  ;;  %v1360_v44 = vmul.f32 -1.442695, %v1070_v42  ;;  %v1085_v45 = vadd.f32 %v1611_v43, %v2184_v37 }
 0x29a   :  { %v1079_v46 = vpop.f32.mrf.mxu1 }
 0x29b   :  { %1735 = vpow2.f32 %v1360_v44  ;;  %v1363_v47 = vmul.f32 -1.442695, %v1085_v45  ;;  %v1080_v48 = vadd.f32 %v2184_v37, %v1079_v46 }
 0x29c   :  { %v1614_v49 = vpop.f32.mrf.mxu1 }
 0x29d   :  { %1737 = vpow2.f32 %v1363_v47  ;;  %v1362_v50 = vmul.f32 -1.442695, %v1080_v48  ;;  %v1095_v51 = vadd.f32 %v1614_v49, %v2184_v37 }
 0x29e   :  { %v1089_v52 = vpop.f32.mrf.mxu1 }
 0x29f   :  { %1739 = vpow2.f32 %v1362_v50  ;;  %v1365_v53 = vmul.f32 -1.442695, %v1095_v51  ;;  %v1090_v54 = vadd.f32 %v2184_v37, %v1089_v52 }
 0x2a0   :  { %v1617_v55 = vpop.f32.mrf.mxu1 }
 0x2a1   :  { %1741 = vpow2.f32 %v1365_v53  ;;  %v1364_v56 = vmul.f32 -1.442695, %v1090_v54  ;;  %v1105_v57 = vadd.f32 %v1617_v55, %v2184_v37 }
 0x2a2   :  { %v1099_v58 = vpop.f32.mrf.mxu1 }
 0x2a3   :  { %1743 = vpow2.f32 %v1364_v56  ;;  %v1367_v59 = vmul.f32 -1.442695, %v1105_v57  ;;  %v1100_v60 = vadd.f32 %v2184_v37, %v1099_v58 }
 0x2a4   :  { %v1620_v61 = vpop.f32.mrf.mxu1 }
 0x2a5   :  { %1745 = vpow2.f32 %v1367_v59  ;;  %v1366_v62 = vmul.f32 -1.442695, %v1100_v60  ;;  %v1115_v63 = vadd.f32 %v1620_v61, %v2184_v37 }
 0x2a6   :  { %v1734_v0 = vpop.eup %1733  ;;  %v1109_v1 = vpop.f32.mrf.mxu1 }
 0x2a7   :  { %v1197_v2 = vadd.f32 1.0, %v1734_v0  ;;  %1747 = vpow2.f32 %v1366_v62  ;;  %v1369_v3 = vmul.f32 -1.442695, %v1115_v63  ;;  %v1110_v4 = vadd.f32 %v2184_v37, %v1109_v1 }
 0x2a8   :  { %v1736_v5 = vpop.eup %1735  ;;  %v1623_v6 = vpop.f32.mrf.mxu1 }
 0x2a9   :  { %1749 = vrcp.f32 %v1197_v2  ;;  %v1196_v7 = vadd.f32 1.0, %v1736_v5  ;;  %v1368_v8 = vmul.f32 -1.442695, %v1110_v4  ;;  %v1125_v9 = vadd.f32 %v1623_v6, %v2184_v37 }
 0x2aa   :  { %v1738_v10 = vpop.eup %1737  ;;  %1751 = vpow2.f32 %v1369_v3  ;;  %v1119_v11 = vpop.f32.mrf.mxu1 }
 0x2ab   :  { %1753 = vrcp.f32 %v1196_v7  ;;  %v1199_v12 = vadd.f32 1.0, %v1738_v10  ;;  %v1371_v13 = vmul.f32 -1.442695, %v1125_v9  ;;  %v1120_v14 = vadd.f32 %v2184_v37, %v1119_v11 }
 0x2ac   :  { %v1740_v15 = vpop.eup %1739  ;;  %1755 = vpow2.f32 %v1368_v8  ;;  %v1626_v16 = vpop.f32.mrf.mxu1 }
 0x2ad   :  { %1757 = vrcp.f32 %v1199_v12  ;;  %v1198_v17 = vadd.f32 1.0, %v1740_v15  ;;  %v1370_v18 = vmul.f32 -1.442695, %v1120_v14  ;;  %v1135_v19 = vadd.f32 %v1626_v16, %v2184_v37 }
 0x2ae   :  { %v1742_v20 = vpop.eup %1741  ;;  %1759 = vpow2.f32 %v1371_v13  ;;  %v1129_v21 = vpop.f32.mrf.mxu1 }
 0x2af   :  { %1761 = vrcp.f32 %v1198_v17  ;;  %v1201_v22 = vadd.f32 1.0, %v1742_v20  ;;  %v1373_v23 = vmul.f32 -1.442695, %v1135_v19  ;;  %v1130_v24 = vadd.f32 %v2184_v37, %v1129_v21 }
 0x2b0   :  { %v1744_v25 = vpop.eup %1743  ;;  %1763 = vpow2.f32 %v1370_v18  ;;  %v1629_v26 = vpop.f32.mrf.mxu1 }
 0x2b1   :  { %1765 = vrcp.f32 %v1201_v22  ;;  %v1200_v27 = vadd.f32 1.0, %v1744_v25  ;;  %v1372_v28 = vmul.f32 -1.442695, %v1130_v24  ;;  %v1145_v29 = vadd.f32 %v1629_v26, %v2184_v37 }
 0x2b2   :  { %v1746_v31 = vpop.eup %1745  ;;  %1767 = vpow2.f32 %v1373_v23  ;;  %v1139_v32 = vpop.f32.mrf.mxu1 }
 0x2b3   :  { %1769 = vrcp.f32 %v1200_v27  ;;  %v1203_v33 = vadd.f32 1.0, %v1746_v31  ;;  %v1375_v34 = vmul.f32 -1.442695, %v1145_v29  ;;  %v1140_v30 = vadd.f32 %v2184_v37, %v1139_v32 }
 0x2b4   :  { %v1748_v35 = vpop.eup %1747  ;;  %1771 = vpow2.f32 %v1372_v28 }
 0x2b5   :  { %1773 = vrcp.f32 %v1203_v33  ;;  %v1202_v36 = vadd.f32 1.0, %v1748_v35  ;;  %v1374_v38 = vmul.f32 -1.442695, %v1140_v30 }
 0x2b6   :  { %v1750_v39 = vpop.eup %1749  ;;  %1775 = vpow2.f32 %v1375_v34 }
 0x2b7   :  { %v1752_v40 = vpop.eup %1751  ;;  %1245 = vst [vmem:[#allocation2 + $0x8] sm:$0xff] %v1750_v39  ;;  %1777 = vrcp.f32 %v1202_v36 }
 0x2b8   :  { %v1754_v41 = vpop.eup %1753  ;;  %v1205_v42 = vadd.f32 1.0, %v1752_v40  ;;  %1779 = vpow2.f32 %v1374_v38 }
 0x2b9   :  { %v1756_v43 = vpop.eup %1755  ;;  %1244 = vst [vmem:[#allocation2] sm:$0xff] %v1754_v41 }
 0x2ba   :  { %v1758_v44 = vpop.eup %1757  ;;  %1781 = vrcp.f32 %v1205_v42  ;;  %v1204_v45 = vadd.f32 1.0, %v1756_v43 }
 0x2bb   :  { %v1760_v46 = vpop.eup %1759  ;;  %1247 = vst [vmem:[#allocation2 + $0x18] sm:$0xff] %v1758_v44 }
 0x2bc   :  { %v1762_v37 = vpop.eup %1761  ;;  %1783 = vrcp.f32 %v1204_v45  ;;  %v1207_v47 = vadd.f32 1.0, %v1760_v46 }
 0x2bd   :  { %v1764_v48 = vpop.eup %1763  ;;  %1246 = vst [vmem:[#allocation2 + $0x10] sm:$0xff] %v1762_v37 }
 0x2be   :  { %v1766_v49 = vpop.eup %1765  ;;  %1785 = vrcp.f32 %v1207_v47  ;;  %v1206_v50 = vadd.f32 1.0, %v1764_v48 }
 0x2bf   :  { %v1768_v51 = vpop.eup %1767  ;;  %1249 = vst [vmem:[#allocation2 + $0x28] sm:$0xff] %v1766_v49 }
 0x2c0   :  { %v1770_v52 = vpop.eup %1769  ;;  %1787 = vrcp.f32 %v1206_v50  ;;  %v1209_v53 = vadd.f32 1.0, %v1768_v51 }
 0x2c1   :  { %v1772_v54 = vpop.eup %1771  ;;  %1248 = vst [vmem:[#allocation2 + $0x20] sm:$0xff] %v1770_v52 }
 0x2c2   :  { %v1774_v55 = vpop.eup %1773  ;;  %1789 = vrcp.f32 %v1209_v53  ;;  %v1208_v56 = vadd.f32 1.0, %v1772_v54 }
 0x2c3   :  { %v1776_v57 = vpop.eup %1775  ;;  %1251 = vst [vmem:[#allocation2 + $0x38] sm:$0xff] %v1774_v55 }
 0x2c4   :  { %v1778_v58 = vpop.eup %1777  ;;  %1791 = vrcp.f32 %v1208_v56  ;;  %v1211_v59 = vadd.f32 1.0, %v1776_v57 }
 0x2c5   :  { %v1780_v60 = vpop.eup %1779  ;;  %1250 = vst [vmem:[#allocation2 + $0x30] sm:$0xff] %v1778_v58 }
 0x2c6   :  { %1793 = vrcp.f32 %v1211_v59  ;;  %v1210_v61 = vadd.f32 1.0, %v1780_v60 }
 0x2c7   :  { %v1782_v62 = vpop.eup %1781 }
 0x2c8   :  { %1253 = vst [vmem:[#allocation2 + $0x48] sm:$0xff] %v1782_v62  ;;  %1795 = vrcp.f32 %v1210_v61 }
 0x2c9   :  { %v1784_v63 = vpop.eup %1783 }
 0x2ca   :  { %1252 = vst [vmem:[#allocation2 + $0x40] sm:$0xff] %v1784_v63 }
 0x2cb   :  { %v1786_v0 = vpop.eup %1785 }
 0x2cc   :  { %1255 = vst [vmem:[#allocation2 + $0x58] sm:$0xff] %v1786_v0 }
 0x2cd   :  { %v1788_v1 = vpop.eup %1787 }
 0x2ce   :  { %1254 = vst [vmem:[#allocation2 + $0x50] sm:$0xff] %v1788_v1 }
 0x2cf   :  { %v1790_v2 = vpop.eup %1789 }
 0x2d0   :  { %1257 = vst [vmem:[#allocation2 + $0x68] sm:$0xff] %v1790_v2 }
 0x2d1   :  { %v1792_v3 = vpop.eup %1791 }
 0x2d2   :  { %1256 = vst [vmem:[#allocation2 + $0x60] sm:$0xff] %v1792_v3 }
 0x2d3   :  { %v1794_v4 = vpop.eup %1793 }
 0x2d4   :  { %1259 = vst [vmem:[#allocation2 + $0x78] sm:$0xff] %v1794_v4 }
 0x2d5   :  { %v1796_v5 = vpop.eup %1795 }
 0x2d6   :  { %1258 = vst [vmem:[#allocation2 + $0x70] sm:$0xff] %v1796_v5 }
 0x2d7   :  { %1264 = vsyncadd [#allocation3], 1920  ;;  %s1819_s10 = smov [#allocation2]  }
 0x2d8   :  { %s1265_s13 = sshll.u32 %s1819_s10, 4  ;;  %s1266_s13 = int_to_ptr.vmem [resolvable:$true] %s1265_s13 }
 0x2d9   :  { %s1797_s14 = scalar_lea.vmem %s1266_s13, 128  ;;  %s1801_s15 = scalar_lea.vmem %s1266_s13, 2048 }
 0x2da   :  { %p1798_p0 = scmp.ne.s32.totalorder %s1266_s13, %s1797_s14  ;;  %p1802_p1 = scmp.lt.s32.totalorder %s1266_s13, %s1266_s13 }
 0x2db   :  { %p1803_p2 = scmp.lt.s32.totalorder %s1801_s15, %s1797_s14 }
 0x2dd   :  { %p1804_p3 = por %p1803_p2, %p1802_p1 }
 0x2df   :  { %p1805_p4 = pnand %p1804_p3, %p1798_p0 }
 0x2e1   :  { %1808 = shalt.err (!%p1805_p4)
}
 0x2e2   :  { %s1820_s1 = smov 128   ;;  %s1821_s2 = smov 8  }
 0x2e3   :  { %1271 = dma.vmem_to_hbm [thread:$0]  %s1266_s13, 128, %s2216_s11, [#allocation3], %s1820_s1, %s1820_s1, %s1821_s2  }
 0x2e4   :  { %1817 = dma.done.wait [#allocation3], 2048  }
 0x2e5   :  { %1818 = vsyncadd [#allocation3], 4294965248 }
 0x2e6   :  { %1275 = vsyncpa [#allocation3], 1 }

</bundles_post_ra>
